<compile_context>
chip_gen: v5e
topology: v5e:2x2
jax: 0.10.0
libtpu: 0.0.40
codegen_flags: <defaults>
</compile_context>

<pallas_src>
import functools

import jax
import jax.numpy as jnp
from jax.experimental import pallas as pl
from jax.experimental.pallas import tpu as pltpu


def _count_kernel(yhat_ref, y_ref, out_ref, *, in_class, num_classes,
                  n_rows, ts, tiles_per_half):
    # yhat_ref: (C, TS, 128)  logits block (streamed dtype)
    # y_ref:    (TS, 128)     labels block (native dtype)
    # out_ref:  (8, 128) int32 accumulator; row 0 = TP partials, row 1 = POS partials
    s = pl.program_id(1)   # spatial half (parallel, for megacore)
    j = pl.program_id(2)   # tile within half (reduction axis, innermost)

    @pl.when(j == 0)
    def _init():
        out_ref[...] = jnp.zeros_like(out_ref)

    labels = y_ref[...].astype(jnp.int32)                        # (TS, 128)

    # Row-validity mask from the *unclamped* global tile index: kills block
    # padding of the last tile and the clamped overflow tile of half s=1.
    row = jax.lax.broadcasted_iota(jnp.int32, labels.shape, 0)   # (TS, 128)
    global_row = (s * tiles_per_half + j) * ts + row
    valid = global_row < n_rows

    y_pos = (labels == in_class) & valid
    pos = jnp.sum(y_pos.astype(jnp.int32), axis=0, keepdims=True)     # (1, 128)

    if in_class == 0:
        # preds[preds != 0] = 0 makes every pred 0, so TP == FN == sum(y == 0).
        tp = pos
    else:
        # argmax(logits, channel) == in_class  <=>
        #   logits[in_class] >  logits[c] for c < in_class  (first-max ties)
        #   logits[in_class] >= logits[c] for c > in_class
        # NOTE(NaN): torch.argmax treats NaN as maximal; here NaN logits yield
        # is_pred=False.  Differs only for NaN-containing inputs.
        lic = yhat_ref[in_class]                                      # (TS, 128)
        is_pred = None
        for c in range(num_classes):
            if c == in_class:
                continue
            other = yhat_ref[c]
            cmp = (lic > other) if c < in_class else (lic >= other)
            is_pred = cmp if is_pred is None else (is_pred & cmp)
        if is_pred is None:                                           # degenerate C == 1
            is_pred = jnp.ones_like(y_pos)
        tp = jnp.sum((is_pred & y_pos).astype(jnp.int32), axis=0, keepdims=True)

    out_ref[0:1, :] += tp
    out_ref[1:2, :] += pos


@functools.partial(jax.jit, static_argnames=("in_class",))
def recall_class(yhat, y, in_class=2, eps=1e-6):
    """Recall of class `in_class`. yhat: (N, C, H, W) float, y: (N, H, W) int."""
    N, C, H, W = yhat.shape
    hw = H * W
    hw_pad = pl.cdiv(hw, 128) * 128

    yhat3 = yhat.reshape(N, C, hw)
    y3 = y.reshape(N, hw)                     # native label dtype, no int32 upcast

    if hw_pad != hw:
        # Only pad to the next multiple of 128 so the dense (rows, 128) view
        # exists; pad labels with a value that can never equal in_class.
        pad_label = in_class - 1 if in_class > 0 else in_class + 1
        yhat3 = jnp.pad(yhat3, ((0, 0), (0, 0), (0, hw_pad - hw)))
        y3 = jnp.pad(y3, ((0, 0), (0, hw_pad - hw)), constant_values=pad_label)

    n_rows = hw_pad // 128
    yhat4 = yhat3.reshape(N, C, n_rows, 128)  # free view (last dim already 128)
    y4 = y3.reshape(N, n_rows, 128)

    # ~4 MiB logits block per grid step (multiple of 8 sublane rows); cap at
    # half the rows so both spatial halves (both v7x TensorCores) get real work.
    itemsize = jnp.dtype(yhat.dtype).itemsize
    ts_cap = max(8, ((4 << 20) // (C * 128 * itemsize)) // 8 * 8)
    if n_rows >= 8:
        half_rows = pl.cdiv(pl.cdiv(n_rows, 2), 8) * 8
        ts = max(8, min(ts_cap, half_rows))
    else:
        ts = n_rows                            # full-dim block (allowed < 8)
    n_tiles = pl.cdiv(n_rows, ts)
    tiles_per_half = pl.cdiv(n_tiles, 2)

    def _tile_idx(s, j):
        # Clamp so the DMA never targets an out-of-range block; the in-kernel
        # row mask (built from the unclamped index) zeroes any duplicate read.
        return jnp.minimum(s * tiles_per_half + j, n_tiles - 1)

    kernel = functools.partial(
        _count_kernel, in_class=in_class, num_classes=C,
        n_rows=n_rows, ts=ts, tiles_per_half=tiles_per_half)

    counts = pl.pallas_call(
        kernel,
        out_shape=jax.ShapeDtypeStruct((N, 2, 8, 128), jnp.int32),
        grid=(N, 2, tiles_per_half),
        in_specs=[
            pl.BlockSpec((None, C, ts, 128), lambda n, s, j: (n, 0, _tile_idx(s, j), 0)),
            pl.BlockSpec((None, ts, 128), lambda n, s, j: (n, _tile_idx(s, j), 0)),
        ],
        out_specs=pl.BlockSpec((None, None, 8, 128), lambda n, s, j: (n, s, 0, 0)),
        compiler_params=pltpu.CompilerParams(
            dimension_semantics=("parallel", "parallel", "arbitrary"),
            vmem_limit_bytes=32 << 20),
    )(yhat4, y4)

    tp = jnp.sum(counts[:, :, 0, :]).astype(jnp.float32)
    pos = jnp.sum(counts[:, :, 1, :]).astype(jnp.float32)
    fn = pos if in_class == 0 else pos - tp
    # TODO(synk): PyTorch returns a host Python float via .cpu().numpy().item();
    # here the result is returned as a JAX scalar.
    return tp / (tp + fn + eps)


def _reference(yhat, y, in_class=2, eps=1e-6):
    probs = jax.nn.softmax(yhat, axis=1)
    preds = jnp.argmax(probs, axis=1)
    preds = jnp.where(preds == in_class, preds, 0)
    tp = jnp.sum((preds == in_class) & (y == in_class)).astype(jnp.float32)
    fn = jnp.sum((preds == 0) & (y == in_class)).astype(jnp.float32)
    return tp / (tp + fn + eps)


if __name__ == "__main__":
    key = jax.random.PRNGKey(0)
    k1, k2 = jax.random.split(key)

    N, C, H, W = 2, 4, 16, 16          # multi-class segmentation logits, NCHW
    yhat = jax.random.normal(k1, (N, C, H, W), dtype=jnp.float32)
    y = jax.random.randint(k2, (N, H, W), 0, C, dtype=jnp.int32)

    out = recall_class(yhat, y)        # in_class=2, as in the PyTorch module
    out = jax.block_until_ready(out)

    ref = _reference(yhat, y)
    assert jnp.allclose(out, ref, atol=1e-6), (out, ref)

    print("KERNEL_OK")
</pallas_src>

<mosaic_0001>
module attributes {stable_mosaic.version = 11 : i64} {
  func.func @_count_kernel(%arg0: i32, %arg1: i32, %arg2: i32, %arg3: memref<1x4x2x128xf32, #tpu.memory_space<vmem>>, %arg4: memref<1x2x128xi32, #tpu.memory_space<vmem>>, %arg5: memref<1x1x8x128xi32, #tpu.memory_space<vmem>>) attributes {dimension_semantics = [#tpu.dimension_semantics<parallel>, #tpu.dimension_semantics<parallel>, #tpu.dimension_semantics<arbitrary>], iteration_bounds = array<i64: 2, 2, 1>, scalar_prefetch = 0 : i64, scratch_operands = 0 : i64, tpu.core_type = #tpu.core_type<tc>, window_params = [{transform_indices = @transform_0, window_bounds = array<i64: 1, 4, 2, 128>}, {transform_indices = @transform_1, window_bounds = array<i64: 1, 2, 128>}, {transform_indices = @transform_2, window_bounds = array<i64: 1, 1, 8, 128>}]} {
    %c0_i32 = arith.constant 0 : i32
    %0 = arith.cmpi eq, %arg2, %c0_i32 : i32
    %1 = arith.extui %0 : i1 to i32
    %c0_i32_0 = arith.constant 0 : i32
    %2 = arith.cmpi ne, %1, %c0_i32_0 : i32
    scf.if %2 {
      %c0_i32_35 = arith.constant 0 : i32
      %48 = vector.broadcast %c0_i32_35 : i32 to vector<8x128xi32>
      %c0_36 = arith.constant 0 : index
      %c0_37 = arith.constant 0 : index
      %c0_38 = arith.constant 0 : index
      %c0_39 = arith.constant 0 : index
      %49 = vector.load %arg5[%c0_36, %c0_37, %c0_38, %c0_39] : memref<1x1x8x128xi32, #tpu.memory_space<vmem>>, vector<1x1x8x128xi32>
      %50 = vector.shape_cast %49 : vector<1x1x8x128xi32> to vector<8x128xi32>
      %51 = vector.shape_cast %48 : vector<8x128xi32> to vector<1x1x8x128xi32>
      tpu.vector_store %arg5[%c0_36, %c0_37, %c0_38, %c0_39], %51 {strides = array<i32>} : memref<1x1x8x128xi32, #tpu.memory_space<vmem>>, vector<1x1x8x128xi32>,
    } else {
    }
    %c0 = arith.constant 0 : index
    %c0_1 = arith.constant 0 : index
    %c0_2 = arith.constant 0 : index
    %3 = vector.load %arg4[%c0, %c0_1, %c0_2] : memref<1x2x128xi32, #tpu.memory_space<vmem>>, vector<1x2x128xi32>
    %4 = vector.shape_cast %3 : vector<1x2x128xi32> to vector<2x128xi32>
    %5 = tpu.iota {dimensions = array<i32: 0>} : vector<2x128xi32>
    %c1_i32 = arith.constant 1 : i32
    %6 = arith.muli %arg1, %c1_i32 : i32
    %7 = arith.addi %6, %arg2 : i32
    %c2_i32 = arith.constant 2 : i32
    %8 = arith.muli %7, %c2_i32 : i32
    %9 = vector.broadcast %8 : i32 to vector<2x128xi32>
    %10 = arith.addi %9, %5 : vector<2x128xi32>
    %c2_i32_3 = arith.constant 2 : i32
    %11 = vector.broadcast %c2_i32_3 : i32 to vector<2x128xi32>
    %12 = arith.cmpi slt, %10, %11 : vector<2x128xi32>
    %c2_i32_4 = arith.constant 2 : i32
    %13 = vector.broadcast %c2_i32_4 : i32 to vector<2x128xi32>
    %14 = arith.cmpi eq, %4, %13 : vector<2x128xi32>
    %15 = arith.andi %14, %12 : vector<2x128xi1>
    %16 = arith.extui %15 : vector<2x128xi1> to vector<2x128xi32>
    %cst = arith.constant dense<0> : vector<128xi32>
    %17 = vector.multi_reduction <add>, %16, %cst [0] : vector<2x128xi32> to vector<128xi32>
    %18 = vector.shape_cast %17 : vector<128xi32> to vector<1x128xi32>
    %c0_5 = arith.constant 0 : index
    %c2 = arith.constant 2 : index
    %c0_6 = arith.constant 0 : index
    %c0_7 = arith.constant 0 : index
    %19 = vector.load %arg3[%c0_5, %c2, %c0_6, %c0_7] : memref<1x4x2x128xf32, #tpu.memory_space<vmem>>, vector<1x1x2x128xf32>
    %20 = vector.shape_cast %19 : vector<1x1x2x128xf32> to vector<2x128xf32>
    %c0_8 = arith.constant 0 : index
    %c0_9 = arith.constant 0 : index
    %c0_10 = arith.constant 0 : index
    %c0_11 = arith.constant 0 : index
    %21 = vector.load %arg3[%c0_8, %c0_9, %c0_10, %c0_11] : memref<1x4x2x128xf32, #tpu.memory_space<vmem>>, vector<1x1x2x128xf32>
    %22 = vector.shape_cast %21 : vector<1x1x2x128xf32> to vector<2x128xf32>
    %23 = arith.cmpf ogt, %20, %22 : vector<2x128xf32>
    %c0_12 = arith.constant 0 : index
    %c1 = arith.constant 1 : index
    %c0_13 = arith.constant 0 : index
    %c0_14 = arith.constant 0 : index
    %24 = vector.load %arg3[%c0_12, %c1, %c0_13, %c0_14] : memref<1x4x2x128xf32, #tpu.memory_space<vmem>>, vector<1x1x2x128xf32>
    %25 = vector.shape_cast %24 : vector<1x1x2x128xf32> to vector<2x128xf32>
    %26 = arith.cmpf ogt, %20, %25 : vector<2x128xf32>
    %27 = arith.andi %23, %26 : vector<2x128xi1>
    %c0_15 = arith.constant 0 : index
    %c3 = arith.constant 3 : index
    %c0_16 = arith.constant 0 : index
    %c0_17 = arith.constant 0 : index
    %28 = vector.load %arg3[%c0_15, %c3, %c0_16, %c0_17] : memref<1x4x2x128xf32, #tpu.memory_space<vmem>>, vector<1x1x2x128xf32>
    %29 = vector.shape_cast %28 : vector<1x1x2x128xf32> to vector<2x128xf32>
    %30 = arith.cmpf oge, %20, %29 : vector<2x128xf32>
    %31 = arith.andi %27, %30 : vector<2x128xi1>
    %32 = arith.andi %31, %15 : vector<2x128xi1>
    %33 = arith.extui %32 : vector<2x128xi1> to vector<2x128xi32>
    %cst_18 = arith.constant dense<0> : vector<128xi32>
    %34 = vector.multi_reduction <add>, %33, %cst_18 [0] : vector<2x128xi32> to vector<128xi32>
    %35 = vector.shape_cast %34 : vector<128xi32> to vector<1x128xi32>
    %c0_19 = arith.constant 0 : index
    %c0_20 = arith.constant 0 : index
    %c0_21 = arith.constant 0 : index
    %c0_22 = arith.constant 0 : index
    %36 = vector.load %arg5[%c0_19, %c0_20, %c0_21, %c0_22] : memref<1x1x8x128xi32, #tpu.memory_space<vmem>>, vector<1x1x1x128xi32>
    %37 = vector.shape_cast %36 : vector<1x1x1x128xi32> to vector<1x128xi32>
    %38 = arith.addi %37, %35 : vector<1x128xi32>
    %c0_23 = arith.constant 0 : index
    %c0_24 = arith.constant 0 : index
    %c0_25 = arith.constant 0 : index
    %c0_26 = arith.constant 0 : index
    %39 = vector.load %arg5[%c0_23, %c0_24, %c0_25, %c0_26] : memref<1x1x8x128xi32, #tpu.memory_space<vmem>>, vector<1x1x1x128xi32>
    %40 = vector.shape_cast %39 : vector<1x1x1x128xi32> to vector<1x128xi32>
    %41 = vector.shape_cast %38 : vector<1x128xi32> to vector<1x1x1x128xi32>
    tpu.vector_store %arg5[%c0_23, %c0_24, %c0_25, %c0_26], %41 {strides = array<i32>} : memref<1x1x8x128xi32, #tpu.memory_space<vmem>>, vector<1x1x1x128xi32>,
    %c0_27 = arith.constant 0 : index
    %c0_28 = arith.constant 0 : index
    %c1_29 = arith.constant 1 : index
    %c0_30 = arith.constant 0 : index
    %42 = vector.load %arg5[%c0_27, %c0_28, %c1_29, %c0_30] : memref<1x1x8x128xi32, #tpu.memory_space<vmem>>, vector<1x1x1x128xi32>
    %43 = vector.shape_cast %42 : vector<1x1x1x128xi32> to vector<1x128xi32>
    %44 = arith.addi %43, %18 : vector<1x128xi32>
    %c0_31 = arith.constant 0 : index
    %c0_32 = arith.constant 0 : index
    %c1_33 = arith.constant 1 : index
    %c0_34 = arith.constant 0 : index
    %45 = vector.load %arg5[%c0_31, %c0_32, %c1_33, %c0_34] : memref<1x1x8x128xi32, #tpu.memory_space<vmem>>, vector<1x1x1x128xi32>
    %46 = vector.shape_cast %45 : vector<1x1x1x128xi32> to vector<1x128xi32>
    %47 = vector.shape_cast %44 : vector<1x128xi32> to vector<1x1x1x128xi32>
    tpu.vector_store %arg5[%c0_31, %c0_32, %c1_33, %c0_34], %47 {strides = array<i32>} : memref<1x1x8x128xi32, #tpu.memory_space<vmem>>, vector<1x1x1x128xi32>,
    return
  }
  func.func @transform_0(%arg0: i32, %arg1: i32, %arg2: i32) -> (i32, i32, i32, i32) {
    %c1_i32 = arith.constant 1 : i32
    %0 = arith.muli %arg1, %c1_i32 : i32
    %1 = arith.addi %0, %arg2 : i32
    %c0_i32 = arith.constant 0 : i32
    %2 = arith.minsi %1, %c0_i32 : i32
    %c0_i32_0 = arith.constant 0 : i32
    %c0_i32_1 = arith.constant 0 : i32
    %c0_i32_2 = arith.constant 0 : i32
    return %arg0, %c0_i32_0, %2, %c0_i32_1 : i32, i32, i32, i32
  }
  func.func @transform_1(%arg0: i32, %arg1: i32, %arg2: i32) -> (i32, i32, i32) {
    %c1_i32 = arith.constant 1 : i32
    %0 = arith.muli %arg1, %c1_i32 : i32
    %1 = arith.addi %0, %arg2 : i32
    %c0_i32 = arith.constant 0 : i32
    %2 = arith.minsi %1, %c0_i32 : i32
    %c0_i32_0 = arith.constant 0 : i32
    %c0_i32_1 = arith.constant 0 : i32
    return %arg0, %2, %c0_i32_0 : i32, i32, i32
  }
  func.func @transform_2(%arg0: i32, %arg1: i32, %arg2: i32) -> (i32, i32, i32, i32) {
    %c0_i32 = arith.constant 0 : i32
    %c0_i32_0 = arith.constant 0 : i32
    %c0_i32_1 = arith.constant 0 : i32
    return %arg0, %arg1, %c0_i32, %c0_i32_0 : i32, i32, i32, i32
  }
}

</mosaic_0001>

<bundles_post_ra>
// kernel: recall_class.1
= control target key start
LH: loop header
LB: loop body
LE: loop exit
PB: predicated region body
PF: predicated region fallthrough
CT: control target
= control target key end

     0   :  { %s526_s9 = smov 0   ;;  %s528_s10 = smov 0   ;;  %s599_s0 = inlined_call_operand.vmem [shape: f32[2,4,2,128], index: 0, kind: input, shape index: {}]   ;;  %s600_s1 = inlined_call_operand.vmem [shape: s32[2,2,128], index: 1, kind: input, shape index: {}]   ;;  %s601_s2 = inlined_call_operand.vmem [shape: s32[2,2,8,128], index: 2, kind: output, shape index: {}]  }
   0x1   :  { %s530_s11 = smov 0   ;;  %s532_s12 = smov 0  }
   0x2   :  { %s534_s13 = smov 0  }
   0x3 LB: > { %s27_s14 = sadd.s32 1, %s500_s11  ;;  %s31_s15 = sadd.s32 1, %s504_s12  ;;  %s508_s13 = sphi %s534_s13, %s12_s13   ;;  %s504_s12 = sphi %s532_s12, %s607_s12   ;;  %s500_s11 = sphi %s530_s11, %s606_s11   ;;  %s496_s10 = sphi %s528_s10, %s605_s10   ;;  %s492_s9 = sphi %s526_s9, %s604_s9  }
   0x4   : > { %p29_p0 = scmp.ge.s32.totalorder %s27_s14, 2  ;;  %p411_p1 = scmp.ge.s32.totalorder %s508_s13, 1 }
   0x5   : > { %p176_p2 = scmp.lt.s32.totalorder %s508_s13, 5 }
   0x6   : > { %s609_s14 = smov (%p29_p0, %s27_s14), 0  ;;  %s611_s15 = smov (!%p29_p0, %s31_s15), %s504_s12 }
   0x7   : > { %p177_p3 = pnand %p411_p1, %p176_p2  ;;  %p33_p4 = scmp.ge.s32.totalorder %s611_s15, 2 }
   0x8   : > { %p218_p5 = scmp.lt.s32.totalorder (!%p177_p3), %s492_s9, 0  ;;  %p220_p6 = scmp.lt.s32.totalorder (!%p177_p3), %s496_s10, 1 }
   0x9   : > { %s613_s15 = smov (%p33_p4, %s611_s15), 0  ;;  %180 = sbr.rel (%p177_p3) target bundleno = 44 (0x2c), region = 28 }
   0xa   : > { %p246_p7 = scmp.lt.s32.totalorder (!%p177_p3), %s492_s9, 1  ;;  %s423_s16 = sshll.u32 (!%p177_p3), %s492_s9, 1 }
   0xe   : > { %v258_v0 = vlaneseq  ;;  %s219_s17 = scalar_select %p218_p5, %s492_s9, 0  ;;  %v262_v2 = vstv %s423_s16  ;;  %vm268_vm2 = vcmask 1041408   ;;  %v510_v10 = vmov 0  }
   0xf   : > { %s615_s10 = smov (!%p220_p6, %s496_s10), 1  ;;  %s619_s9 = smov (!%p246_p7, %s492_s9), 1 }
  0x10   : > { %v259_v1 = vshrl.u32 %v258_v0, 7  ;;  %s617_s17 = smov (!%p218_p5, %s219_s17), 0  ;;  %s415_s18 = sshll.u32 %s615_s10, 2 }
  0x11   : > { %s421_s19 = sshll.u32 %s615_s10, 1  ;;  %s225_s20 = sadd.s32 %s415_s18, %s617_s17 }
  0x12   : > { %v263_v3 = vadd.s32 %v262_v2, %v259_v1  ;;  %s238_s21 = sadd.s32 %s617_s17, %s615_s10  ;;  %s416_s22 = sshll.u32 %s225_s20, 1 }
  0x13   : > { %s420_s23 = sshll.u32 %s238_s21, 1  ;;  %s227_s26 = scalar_lea.vmem %s599_s0, %s416_s22 }
  0x14   : > { %s240_s29 = scalar_lea.vmem %s600_s1, %s420_s23  ;;  %vm264_vm0 = vcmp.lt.s32.totalorder %v263_v3, 2  ;;  %v424_v5 = vld [vmem:[%s227_s26 + $0x4] sm:$0x3]  ;;  %v278_v6 = vld [vmem:[%s227_s26] sm:$0x3]  ;;  %s249_s30 = sadd.s32 %s421_s19, %s619_s9 }
  0x15   : > { %v257_v4 = vld [vmem:[%s240_s29] sm:$0x3]  ;;  %v425_v7 = vld [vmem:[%s227_s26 + $0x2] sm:$0x3]  ;;  %vm279_vm4 = vcmp.gt.f32.partialorder %v424_v5, %v278_v6  ;;  %v426_v9 = vld [vmem:[%s227_s26 + $0x6] sm:$0x3] }
  0x16   : > { %vm265_vm1 = vcmp.eq.s32.totalorder %v257_v4, 2  ;;  %vm282_vm5 = vcmp.gt.f32.partialorder %v424_v5, %v425_v7  ;;  %s422_s3 = sshll.u32 %s249_s30, 3  ;;  %vm286_vm7 = vcmp.ge.f32.partialorder %v424_v5, %v426_v9 }
  0x17   : > { %vm571_vm3 = vmand %vm265_vm1, %vm264_vm0  ;;  %s251_s6 = scalar_lea.vmem %s601_s2, %s422_s3 }
  0x18   : > { %v267_v11 = vsel %vm571_vm3, 1, %v510_v10  ;;  %vm283_vm6 = vmand %vm279_vm4, %vm282_vm5  ;;  %256 = vst [vmem:[%s251_s6] sm:$0xff] %v510_v10 }
  0x19   : > { %v269_v12 = vsel %vm268_vm2, %v267_v11, 0  ;;  %vm287_vm8 = vmand %vm283_vm6, %vm286_vm7 }
  0x1a   : > { %v270_v13 = vrot.slane %v269_v12, 4  ;;  %vm288_vm9 = vmand %vm287_vm8, %vm571_vm3 }
  0x1b   : > { %v289_v14 = vsel %vm288_vm9, 1, %v510_v10 }
  0x1c   : > { %v271_v15 = vadd.s32 %v270_v13, %v269_v12  ;;  %v290_v16 = vsel %vm268_vm2, %v289_v14, 0 }
  0x1d   : > { %v291_v17 = vrot.slane %v290_v16, 4 }
  0x1e   : > { %v272_v18 = vrot.slane %v271_v15, 2 }
  0x1f   : > { %v292_v19 = vadd.s32 %v291_v17, %v290_v16  ;;  %v300_v24 = vld [vmem:[%s251_s6 + $0x1] sm:$0x1]  ;;  %v297_v27 = vld [vmem:[%s251_s6] sm:$0x1] }
  0x20   : > { %v273_v20 = vadd.s32 %v272_v18, %v271_v15 }
  0x21   : > { %v293_v21 = vrot.slane %v292_v19, 2 }
  0x22   : > { %v274_v22 = vrot.slane %v273_v20, 1 }
  0x23   : > { %v294_v23 = vadd.s32 %v293_v21, %v292_v19 }
  0x24   : > { %v275_v25 = vadd.s32 %v274_v22, %v273_v20 }
  0x25   : > { %v295_v26 = vrot.slane %v294_v23, 1 }
  0x26   : > { %v301_v28 = vadd.s32 %v300_v24, %v275_v25 }
  0x27   : > { %v296_v29 = vadd.s32 %v295_v26, %v294_v23 }
  0x28   : > { %302 = vst [vmem:[%s251_s6 + $0x1] sm:$0x1] %v301_v28 }
  0x29   : > { %v298_v30 = vadd.s32 %v297_v27, %v296_v29 }
  0x2b   : > { %299 = vst [vmem:[%s251_s6] sm:$0x1] %v298_v30 }
  0x2c PF: > { %s12_s13 = sadd.s32 1, %s508_s13   ;;  %s604_s9 = smov %s500_s11 }
  0x2d   : > { %p9_p8 = scmp.ge.s32.totalorder %s12_s13, 6   ;;  %s605_s10 = smov %s504_s12 }
  0x2e   : > { %s606_s11 = smov %s609_s14  ;;  %s607_s12 = smov %s613_s15 }
  0x2f   :  { %11 = sbr.rel (!%p9_p8) target bundleno = 3 (0x3), region = 68 }

</bundles_post_ra>
